<compile_context>
chip_gen: v7x
topology: tpu7x:2x2x1
jax: 0.10.0
libtpu: 0.0.40
codegen_flags: <defaults>
</compile_context>

<pallas_src>
import functools

import jax
import jax.numpy as jnp
from jax import lax
from jax.experimental import pallas as pl
from jax.experimental.pallas import tpu as pltpu

LANE = 128


# ----------------------------------------------------------------------------- kernel


def _branch(x_ref, t_ref, out_ref, *, i_local, kind, out_row, tile_rows, num_tiles,
            n_valid):
    """Per-element loss on one (tile_rows, 128) tile, reduced over sublanes into a
    (1, 128) lane-partial written to row `out_row` of the (2, 128) output block."""
    x = x_ref[...].astype(jnp.float32)
    t = t_ref[...].astype(jnp.float32)

    if kind == "bce":
        # Numerically stable BCE-with-logits (matches torch.nn.BCEWithLogitsLoss).
        per = jnp.maximum(x, 0.0) - x * t + jnp.log1p(jnp.exp(-jnp.abs(x)))
    else:  # "mse"
        d = x - t
        per = d * d

    def write(p):
        out_ref[out_row:out_row + 1, :] = jnp.sum(p, axis=0, keepdims=True)
        out_ref[1 - out_row:2 - out_row, :] = jnp.zeros((1, LANE), jnp.float32)

    full = num_tiles * tile_rows * LANE
    if n_valid == full:                      # no lane padding, no ragged tile
        write(per)
        return

    # Only the LAST tile of this branch contains padded / unspecified elements.
    # `tail` is the number of valid elements in that tile (Python int, fits int32).
    tail = n_valid - (num_tiles - 1) * tile_rows * LANE

    def masked():
        row = lax.broadcasted_iota(jnp.int32, (tile_rows, LANE), 0)
        col = lax.broadcasted_iota(jnp.int32, (tile_rows, LANE), 1)
        return jnp.where(row * LANE + col < tail, per, 0.0)   # select, not multiply

    if num_tiles == 1:
        write(masked())
    else:
        @pl.when(i_local == num_tiles - 1)
        def _():
            write(masked())

        @pl.when(i_local != num_tiles - 1)
        def _():
            write(per)


def _fused_kernel(x1_ref, t1_ref, x2_ref, t2_ref, out_ref,
                  *, nb, nm, tr1, tr2, n1, n2):
    i = pl.program_id(0)

    @pl.when(i < nb)
    def _():
        _branch(x1_ref, t1_ref, out_ref, i_local=i, kind="bce", out_row=0,
                tile_rows=tr1, num_tiles=nb, n_valid=n1)

    @pl.when(i >= nb)
    def _():
        _branch(x2_ref, t2_ref, out_ref, i_local=i - nb, kind="mse", out_row=1,
                tile_rows=tr2, num_tiles=nm, n_valid=n2)


# ----------------------------------------------------------------------------- wrapper


def _to_lane_dense(x):
    """Flatten to (rows, 128) in native dtype.  Pads only to the next lane multiple
    (tiny, and only when n % 128 != 0); tail elements are masked in-kernel."""
    n = x.size
    flat = x.reshape(-1)
    rem = n % LANE
    if rem:
        flat = jnp.pad(flat, (0, LANE - rem))
    rows = flat.size // LANE
    return flat.reshape(rows, LANE), n, rows


def _tile_cap(arrs, max_tile_rows):
    """Row-tile cap so the double-buffered input pipeline stays within a safe VMEM
    budget on all generations (v5e: 16 MiB default scoped; v6e/v7x: 32 MiB)."""
    if max_tile_rows is not None:
        return max(8, (int(max_tile_rows) // 8) * 8)
    try:
        vmem = pltpu.get_tpu_info().vmem_capacity_bytes
    except Exception:  # pragma: no cover - conservative fallback off-TPU
        vmem = 64 << 20
    budget = min(8 << 20, vmem // 8)                     # pipeline-buffer budget
    bytes_per_row = 2 * LANE * sum(int(a.dtype.itemsize) for a in arrs)  # 2 = dbl-buf
    cap = budget // bytes_per_row
    # Multiple of 32 sublanes (covers f32/bf16/8-bit packing); ~1 MiB f32 blocks.
    return int(max(32, min(8192, (cap // 32) * 32)))


def two_way_loss(predictions, targets, *, w1=1.0, w2=1.0, max_tile_rows=None):
    """Pallas-backed TwoWayLoss.forward: returns (total_loss, bce_loss, l2_loss)."""
    pred1, pred2 = predictions
    target1, target2 = targets
    assert pred1.shape == target1.shape, (pred1.shape, target1.shape)
    assert pred2.shape == target2.shape, (pred2.shape, target2.shape)

    x1, n1, rows1 = _to_lane_dense(pred1)
    t1, _, _ = _to_lane_dense(target1)
    x2, n2, rows2 = _to_lane_dense(pred2)
    t2, _, _ = _to_lane_dense(target2)

    cap = _tile_cap([x1, t1, x2, t2], max_tile_rows)
    tr1 = rows1 if rows1 <= cap else cap      # full-extent block when it fits
    tr2 = rows2 if rows2 <= cap else cap
    nb = pl.cdiv(rows1, tr1)
    nm = pl.cdiv(rows2, tr2)
    grid = nb + nm                            # always >= 2: both TCs have work

    kernel = functools.partial(_fused_kernel, nb=nb, nm=nm, tr1=tr1, tr2=tr2,
                               n1=n1, n2=n2)

    partials = pl.pallas_call(
        kernel,
        out_shape=jax.ShapeDtypeStruct((grid, 2, LANE), jnp.float32),
        grid=(grid,),
        in_specs=[
            # Clamp the inactive branch to its last/first block -> no re-fetch.
            pl.BlockSpec((tr1, LANE), lambda i: (jnp.minimum(i, nb - 1), 0)),
            pl.BlockSpec((tr1, LANE), lambda i: (jnp.minimum(i, nb - 1), 0)),
            pl.BlockSpec((tr2, LANE), lambda i: (jnp.maximum(i - nb, 0), 0)),
            pl.BlockSpec((tr2, LANE), lambda i: (jnp.maximum(i - nb, 0), 0)),
        ],
        # One lane-dense (2, 128) partial block per grid step (row0=BCE, row1=MSE).
        out_specs=pl.BlockSpec((None, 2, LANE), lambda i: (i, 0, 0)),
        compiler_params=pltpu.CompilerParams(dimension_semantics=("parallel",)),
    )(x1, t1, x2, t2)

    bce_loss = jnp.sum(partials[:, 0, :]) / jnp.float32(n1)
    l2_loss = jnp.sum(partials[:, 1, :]) / jnp.float32(n2)
    total_loss = bce_loss * w1 + l2_loss * w2
    return total_loss, bce_loss, l2_loss


# ----------------------------------------------------------------------------- test


def _reference(pred1, target1, pred2, target2, w1, w2):
    x = pred1.astype(jnp.float32)
    t = target1.astype(jnp.float32)
    bce = jnp.mean(jnp.maximum(x, 0.0) - x * t + jnp.log1p(jnp.exp(-jnp.abs(x))))
    d = pred2.astype(jnp.float32) - target2.astype(jnp.float32)
    mse = jnp.mean(d * d)
    return bce * w1 + mse * w2, bce, mse


if __name__ == "__main__":
    key = jax.random.PRNGKey(0)
    k1, k2, k3, k4 = jax.random.split(key, 4)

    # Branch 1: segmentation-style logits vs. binary targets (NCHW).
    pred1 = jax.random.normal(k1, (2, 4, 16, 16), dtype=jnp.float32)
    target1 = (jax.random.uniform(k2, (2, 4, 16, 16)) > 0.5).astype(jnp.float32)
    # Branch 2: regression head (exercises the lane-padding mask: 64 elems < 128).
    pred2 = jax.random.normal(k3, (2, 32), dtype=jnp.float32)
    target2 = jax.random.normal(k4, (2, 32), dtype=jnp.float32)

    w1, w2 = 1.0, 1.0
    total, bce, l2 = two_way_loss((pred1, pred2), (target1, target2), w1=w1, w2=w2)
    total = jax.block_until_ready(total)

    tot_ref, bce_ref, l2_ref = _reference(pred1, target1, pred2, target2, w1, w2)
    assert jnp.allclose(bce, bce_ref, atol=1e-5, rtol=1e-5), (float(bce), float(bce_ref))
    assert jnp.allclose(l2, l2_ref, atol=1e-5, rtol=1e-5), (float(l2), float(l2_ref))
    assert jnp.allclose(total, tot_ref, atol=1e-5, rtol=1e-5), (float(total), float(tot_ref))

    # Secondary check: force multiple row-tiles + a ragged last tile (BCE branch) and
    # a non-lane-aligned second branch, exercising the gated tail mask and tiling.
    k5, k6, k7, k8 = jax.random.split(jax.random.PRNGKey(1), 4)
    p1 = jax.random.normal(k5, (3, 5, 16, 16), dtype=jnp.float32)       # 3840 elems
    t1 = (jax.random.uniform(k6, (3, 5, 16, 16)) > 0.5).astype(jnp.float32)
    p2 = jax.random.normal(k7, (5, 50), dtype=jnp.float32)              # 250 elems
    t2 = jax.random.normal(k8, (5, 50), dtype=jnp.float32)
    tot2, bce2, l22 = two_way_loss((p1, p2), (t1, t2), w1=0.7, w2=1.3, max_tile_rows=8)
    tot2 = jax.block_until_ready(tot2)
    tot2_ref, bce2_ref, l22_ref = _reference(p1, t1, p2, t2, 0.7, 1.3)
    assert jnp.allclose(bce2, bce2_ref, atol=1e-5, rtol=1e-5), (float(bce2), float(bce2_ref))
    assert jnp.allclose(l22, l22_ref, atol=1e-5, rtol=1e-5), (float(l22), float(l22_ref))
    assert jnp.allclose(tot2, tot2_ref, atol=1e-5, rtol=1e-5), (float(tot2), float(tot2_ref))

    print("KERNEL_OK")
</pallas_src>

<mosaic_0001>
module attributes {stable_mosaic.version = 11 : i64} {
  func.func @_fused_kernel(%arg0: i32, %arg1: memref<16x128xf32, #tpu.memory_space<vmem>>, %arg2: memref<16x128xf32, #tpu.memory_space<vmem>>, %arg3: memref<1x128xf32, #tpu.memory_space<vmem>>, %arg4: memref<1x128xf32, #tpu.memory_space<vmem>>, %arg5: memref<1x2x128xf32, #tpu.memory_space<vmem>>) attributes {dimension_semantics = [#tpu.dimension_semantics<parallel>], iteration_bounds = array<i64: 2>, scalar_prefetch = 0 : i64, scratch_operands = 0 : i64, tpu.core_type = #tpu.core_type<tc>, window_params = [{transform_indices = @transform_0, window_bounds = array<i64: 16, 128>}, {transform_indices = @transform_1, window_bounds = array<i64: 16, 128>}, {transform_indices = @transform_2, window_bounds = array<i64: 1, 128>}, {transform_indices = @transform_3, window_bounds = array<i64: 1, 128>}, {transform_indices = @transform_4, window_bounds = array<i64: 1, 2, 128>}]} {
    %c1_i32 = arith.constant 1 : i32
    %0 = arith.cmpi slt, %arg0, %c1_i32 : i32
    %1 = arith.extui %0 : i1 to i32
    %c0_i32 = arith.constant 0 : i32
    %2 = arith.cmpi ne, %1, %c0_i32 : i32
    scf.if %2 {
      %c0 = arith.constant 0 : index
      %c0_2 = arith.constant 0 : index
      %6 = vector.load %arg1[%c0, %c0_2] : memref<16x128xf32, #tpu.memory_space<vmem>>, vector<16x128xf32>
      %c0_3 = arith.constant 0 : index
      %c0_4 = arith.constant 0 : index
      %7 = vector.load %arg2[%c0_3, %c0_4] : memref<16x128xf32, #tpu.memory_space<vmem>>, vector<16x128xf32>
      %cst = arith.constant 0.000000e+00 : f32
      %8 = vector.broadcast %cst : f32 to vector<16x128xf32>
      %9 = arith.maximumf %6, %8 : vector<16x128xf32>
      %10 = arith.mulf %6, %7 : vector<16x128xf32>
      %11 = arith.subf %9, %10 : vector<16x128xf32>
      %12 = math.absf %6 : vector<16x128xf32>
      %cst_5 = arith.constant 0.000000e+00 : f32
      %13 = vector.broadcast %cst_5 : f32 to vector<16x128xf32>
      %14 = arith.subf %13, %12 : vector<16x128xf32>
      %15 = math.exp %14 : vector<16x128xf32>
      %16 = math.log1p %15 : vector<16x128xf32>
      %17 = arith.addf %11, %16 : vector<16x128xf32>
      %cst_6 = arith.constant dense<0.000000e+00> : vector<128xf32>
      %18 = vector.multi_reduction <add>, %17, %cst_6 [0] : vector<16x128xf32> to vector<128xf32>
      %19 = vector.shape_cast %18 : vector<128xf32> to vector<1x128xf32>
      %c0_7 = arith.constant 0 : index
      %c0_8 = arith.constant 0 : index
      %c0_9 = arith.constant 0 : index
      %20 = vector.load %arg5[%c0_7, %c0_8, %c0_9] : memref<1x2x128xf32, #tpu.memory_space<vmem>>, vector<1x1x128xf32>
      %21 = vector.shape_cast %20 : vector<1x1x128xf32> to vector<1x128xf32>
      %22 = vector.shape_cast %19 : vector<1x128xf32> to vector<1x1x128xf32>
      tpu.vector_store %arg5[%c0_7, %c0_8, %c0_9], %22 {strides = array<i32>} : memref<1x2x128xf32, #tpu.memory_space<vmem>>, vector<1x1x128xf32>,
      %cst_10 = arith.constant 0.000000e+00 : f32
      %23 = vector.broadcast %cst_10 : f32 to vector<1x128xf32>
      %c0_11 = arith.constant 0 : index
      %c1 = arith.constant 1 : index
      %c0_12 = arith.constant 0 : index
      %24 = vector.load %arg5[%c0_11, %c1, %c0_12] : memref<1x2x128xf32, #tpu.memory_space<vmem>>, vector<1x1x128xf32>
      %25 = vector.shape_cast %24 : vector<1x1x128xf32> to vector<1x128xf32>
      %26 = vector.shape_cast %23 : vector<1x128xf32> to vector<1x1x128xf32>
      tpu.vector_store %arg5[%c0_11, %c1, %c0_12], %26 {strides = array<i32>} : memref<1x2x128xf32, #tpu.memory_space<vmem>>, vector<1x1x128xf32>,
    } else {
    }
    %c1_i32_0 = arith.constant 1 : i32
    %3 = arith.cmpi sge, %arg0, %c1_i32_0 : i32
    %4 = arith.extui %3 : i1 to i32
    %c0_i32_1 = arith.constant 0 : i32
    %5 = arith.cmpi ne, %4, %c0_i32_1 : i32
    scf.if %5 {
      %c0 = arith.constant 0 : index
      %c0_2 = arith.constant 0 : index
      %6 = vector.load %arg3[%c0, %c0_2] : memref<1x128xf32, #tpu.memory_space<vmem>>, vector<1x128xf32>
      %c0_3 = arith.constant 0 : index
      %c0_4 = arith.constant 0 : index
      %7 = vector.load %arg4[%c0_3, %c0_4] : memref<1x128xf32, #tpu.memory_space<vmem>>, vector<1x128xf32>
      %8 = arith.subf %6, %7 : vector<1x128xf32>
      %9 = arith.mulf %8, %8 : vector<1x128xf32>
      %10 = tpu.iota {dimensions = array<i32: 0>} : vector<1x128xi32>
      %11 = tpu.iota {dimensions = array<i32: 1>} : vector<1x128xi32>
      %c128_i32 = arith.constant 128 : i32
      %12 = vector.broadcast %c128_i32 : i32 to vector<1x128xi32>
      %13 = arith.muli %10, %12 : vector<1x128xi32>
      %14 = arith.addi %13, %11 : vector<1x128xi32>
      %c64_i32 = arith.constant 64 : i32
      %15 = vector.broadcast %c64_i32 : i32 to vector<1x128xi32>
      %16 = arith.cmpi slt, %14, %15 : vector<1x128xi32>
      %cst = arith.constant 0.000000e+00 : f32
      %17 = vector.broadcast %cst : f32 to vector<1x128xf32>
      %18 = arith.select %16, %9, %17 : vector<1x128xi1>, vector<1x128xf32>
      %cst_5 = arith.constant dense<0.000000e+00> : vector<128xf32>
      %19 = vector.multi_reduction <add>, %18, %cst_5 [0] : vector<1x128xf32> to vector<128xf32>
      %20 = vector.shape_cast %19 : vector<128xf32> to vector<1x128xf32>
      %c0_6 = arith.constant 0 : index
      %c1 = arith.constant 1 : index
      %c0_7 = arith.constant 0 : index
      %21 = vector.load %arg5[%c0_6, %c1, %c0_7] : memref<1x2x128xf32, #tpu.memory_space<vmem>>, vector<1x1x128xf32>
      %22 = vector.shape_cast %21 : vector<1x1x128xf32> to vector<1x128xf32>
      %23 = vector.shape_cast %20 : vector<1x128xf32> to vector<1x1x128xf32>
      tpu.vector_store %arg5[%c0_6, %c1, %c0_7], %23 {strides = array<i32>} : memref<1x2x128xf32, #tpu.memory_space<vmem>>, vector<1x1x128xf32>,
      %cst_8 = arith.constant 0.000000e+00 : f32
      %24 = vector.broadcast %cst_8 : f32 to vector<1x128xf32>
      %c0_9 = arith.constant 0 : index
      %c0_10 = arith.constant 0 : index
      %c0_11 = arith.constant 0 : index
      %25 = vector.load %arg5[%c0_9, %c0_10, %c0_11] : memref<1x2x128xf32, #tpu.memory_space<vmem>>, vector<1x1x128xf32>
      %26 = vector.shape_cast %25 : vector<1x1x128xf32> to vector<1x128xf32>
      %27 = vector.shape_cast %24 : vector<1x128xf32> to vector<1x1x128xf32>
      tpu.vector_store %arg5[%c0_9, %c0_10, %c0_11], %27 {strides = array<i32>} : memref<1x2x128xf32, #tpu.memory_space<vmem>>, vector<1x1x128xf32>,
    } else {
    }
    return
  }
  func.func @transform_0(%arg0: i32) -> (i32, i32) {
    %c0_i32 = arith.constant 0 : i32
    %0 = arith.minsi %arg0, %c0_i32 : i32
    %c0_i32_0 = arith.constant 0 : i32
    %c0_i32_1 = arith.constant 0 : i32
    return %0, %c0_i32_0 : i32, i32
  }
  func.func @transform_1(%arg0: i32) -> (i32, i32) {
    %c0_i32 = arith.constant 0 : i32
    %0 = arith.minsi %arg0, %c0_i32 : i32
    %c0_i32_0 = arith.constant 0 : i32
    %c0_i32_1 = arith.constant 0 : i32
    return %0, %c0_i32_0 : i32, i32
  }
  func.func @transform_2(%arg0: i32) -> (i32, i32) {
    %c1_i32 = arith.constant 1 : i32
    %0 = arith.subi %arg0, %c1_i32 : i32
    %c0_i32 = arith.constant 0 : i32
    %1 = arith.maxsi %0, %c0_i32 : i32
    %c0_i32_0 = arith.constant 0 : i32
    %c0_i32_1 = arith.constant 0 : i32
    return %1, %c0_i32_0 : i32, i32
  }
  func.func @transform_3(%arg0: i32) -> (i32, i32) {
    %c1_i32 = arith.constant 1 : i32
    %0 = arith.subi %arg0, %c1_i32 : i32
    %c0_i32 = arith.constant 0 : i32
    %1 = arith.maxsi %0, %c0_i32 : i32
    %c0_i32_0 = arith.constant 0 : i32
    %c0_i32_1 = arith.constant 0 : i32
    return %1, %c0_i32_0 : i32, i32
  }
  func.func @transform_4(%arg0: i32) -> (i32, i32, i32) {
    %c0_i32 = arith.constant 0 : i32
    %c0_i32_0 = arith.constant 0 : i32
    %c0_i32_1 = arith.constant 0 : i32
    return %arg0, %c0_i32, %c0_i32_0 : i32, i32, i32
  }
}

</mosaic_0001>

<bundles_post_ra>
// kernel: tpu_custom_call.1
= control target key start
LH: loop header
LB: loop body
LE: loop exit
PB: predicated region body
PF: predicated region fallthrough
CT: control target
= control target key end

     0   :  { %s1118_s0 = inlined_call_operand.hbm [shape: f32[16,128], index: 0, kind: input, shape index: {}]   ;;  %s1119_s1 = inlined_call_operand.hbm [shape: f32[16,128], index: 1, kind: input, shape index: {}]   ;;  %s1120_s2 = inlined_call_operand.vmem [shape: f32[1,128], index: 2, kind: input, shape index: {}]   ;;  %s1121_s3 = inlined_call_operand.vmem [shape: f32[1,128], index: 3, kind: input, shape index: {}]   ;;  %s1122_s4 = inlined_call_operand.hbm [shape: f32[2,2,128], index: 4, kind: output, shape index: {}]  }
   0x1   :  { %1128 = sst [smem:[#allocation13_spill]] %s1118_s0 }
   0x2   :  { %9 = vsyncpa [#allocation3], 0 }
   0x3   :  { %11 = vsyncpa [#allocation3 + $0x1], 0 }
   0x4   :  { %12 = vsyncpa [#allocation6], 0 }
   0x5   :  { %14 = vsyncpa [#allocation6 + $0x1], 0 }
   0x6   :  { %15 = vsyncpa [#allocation4], 0 }
   0x7   :  { %17 = vsyncpa [#allocation4 + $0x1], 0  ;;  %s851_s15 = smov 0   ;;  %s853_s16 = smov 0  }
   0x8   :  { %s855_s17 = smov 0   ;;  %s857_s18 = smov 0  }
   0x9   :  { %s859_s19 = smov 0   ;;  %s861_s20 = smov 0  }
   0xa   :  { %s863_s21 = smov 0  }
   0xb LB: > { %1129 = sst [smem:[#allocation11_spill]] %s813_s20  ;;  %s885_s22 = sadd.s32 4294967295, %s817_s21   ;;  %s817_s21 = sphi %s863_s21, %s1152_s21   ;;  %s813_s20 = sphi %s861_s20, %s1146_s20   ;;  %s809_s19 = sphi %s859_s19, %s1151_s19   ;;  %s805_s18 = sphi %s857_s18, %s1150_s18   ;;  %s801_s17 = sphi %s855_s17, %s1149_s17   ;;  %s797_s16 = sphi %s853_s16, %s1148_s16   ;;  %s793_s15 = sphi %s851_s15, %s1147_s15  }
   0xc   : > { %s539_s23 = sadd.s32 4294967294, %s817_s21   ;;  %s889_s24 = sadd.s32 1, %s817_s21  }
   0xd   : > { %p27_p0 = scmp.lt.s32.totalorder %s817_s21, 0  ;;  %p29_p1 = scmp.lt.s32.totalorder %s889_s24, 0 }
   0xe   : > { %s34_s25 = sadd.s32 1, %s813_s20  ;;  %p41_p2 = scmp.ne.s32.totalorder %s813_s20, %s809_s19 }
   0xf   : > { %s895_s26 = scalar_select %p27_p0, %s817_s21, 0 }
  0x10   : > { %s30_s27 = scalar_select %p29_p1, %s889_s24, 0 }
  0x11   : > { %p42_p3 = scmp.eq.s32.totalorder %s817_s21, 0  ;;  %p47_p4 = scmp.ne.s32.totalorder %s809_s19, %s805_s18 }
  0x12   : > { %s31_s28 = ssub.s32 %s895_s26, %s30_s27  ;;  %p48_p7 = scmp.eq.s32.totalorder %s885_s22, 0 }
  0x13   : > { %p32_p5 = scmp.eq.s32.totalorder %s31_s28, 0  ;;  %p903_p6 = por %p42_p3, %p41_p2 }
  0x14   : > { %s151_s30 = ssub.s32 %s817_s21, %s889_s24  ;;  %p913_p8 = por %p48_p7, %p47_p4 }
  0x15   : > { %s911_s5 = scalar_select %p32_p5, %s813_s20, %s34_s25  }
  0x16   : > { %s1132_s6 = scalar_select %p913_p8, 1, 0 }
  0x17   : > { %1131 = sst [smem:[#allocation12_spill]] %s911_s5  ;;  %p152_p9 = scmp.eq.s32.totalorder %s151_s30, 0 }
  0x18   : > { %s154_s7 = sadd.s32 1, %s801_s17  ;;  %p164_p10 = scmp.ne.s32.totalorder %s801_s17, %s797_s16 }
  0x19   : > { %s921_s8 = scalar_select %p152_p9, %s801_s17, %s154_s7  }
  0x1a   : > { %p165_p11 = scmp.eq.s32.totalorder %s885_s22, 1  ;;  %p170_p12 = scmp.ne.s32.totalorder %s797_s16, %s793_s15 }
  0x1b   : > { %p171_p13 = scmp.eq.s32.totalorder %s539_s23, 1  ;;  %p593_p2 = scmp.lt.s32.totalorder %s817_s21, 2 }
  0x1c   : > { %p927_p1 = por %p165_p11, %p164_p10  ;;  %s937_s11 = sand.u32 1, %s813_s20  }
  0x1d   : > { %p932_p3 = por %p171_p13, %p170_p12  ;;  %s1123_s12 = sshll.u32 %s937_s11, 4 }
  0x1e   : > { %s1133_s9 = scalar_select %p927_p1, 1, 0 }
  0x1f   : > { %s1134_s10 = scalar_select %p932_p3, 1, 0 }
  0x20   : > { %s1124_s13 = sshll.u32 %s895_s26, 8  ;;  %s1135_s0 = sld [smem:[#allocation13_spill]] }
  0x21   : > { %s195_s25 = scalar_lea.vmem [#allocation2], %s1123_s12  ;;  %p954_p4 = pnand %p593_p2, %p903_p6 }
  0x22   : > { %s204_s27 = sshll.u32 %s195_s25, 4  ;;  %s192_s30 = scalar_lea.sflag [#allocation3], %s937_s11  ;;  %s950_s27 = int_to_ptr.vmem [resolvable:$true] %s204_s27 }
  0x23   : > { %p665_p9 = pneg %p954_p4 }
  0x26   : > { %s946_s23 = scalar_lea.hbm %s1135_s0, %s1124_s13  ;;  %s668_s29 = scalar_lea.hbm %s1135_s0, 256 }
  0x27   : > { %s663_s7 = scalar_lea.hbm %s946_s23, 256  ;;  %p669_p6 = scmp.lt.u32.totalorder %s946_s23, %s1135_s0 }
  0x28   : > { %p664_p7 = scmp.ne.s32.totalorder %s946_s23, %s663_s7  ;;  %p670_p12 = scmp.lt.u32.totalorder %s668_s29, %s663_s7 }
  0x29   : > { %p672_p2 = scmp.lt.u32.totalorder %s663_s7, %s946_s23 }
  0x2a   : > { %p666_p10 = pnand %p665_p9, %p664_p7  ;;  %p671_p13 = por %p670_p12, %p669_p6 }
  0x2c   : > { %p667_p11 = pneg %p666_p10  ;;  %p673_p0 = por %p672_p2, %p671_p13 }
  0x2e   : > { %p674_p5 = pnand %p673_p0, %p667_p11 }
  0x30   : > { %677 = shalt.err (!%p674_p5)
}
  0x31   : > { %s678_s13 = scalar_lea.vmem %s950_s27, 256  ;;  %s819_s14 = smov [#allocation2]  }
  0x32   : > { %p679_p7 = scmp.ne.s32.totalorder %s950_s27, %s678_s13  ;;  %s683_s18 = sshll.u32 %s819_s14, 4  ;;  %s684_s18 = int_to_ptr.vmem [resolvable:$false] %s683_s18 }
  0x33   : > { %s685_s12 = scalar_lea.vmem %s684_s18, 512  ;;  %p686_p1 = scmp.lt.s32.totalorder %s950_s27, %s684_s18 }
  0x34   : > { %p681_p10 = pnand %p679_p7, %p665_p9  ;;  %p687_p6 = scmp.lt.s32.totalorder %s685_s12, %s678_s13 }
  0x36   : > { %p682_p3 = pneg %p681_p10  ;;  %p688_p12 = por %p687_p6, %p686_p1 }
  0x38   : > { %p689_p13 = pnand %p688_p12, %p682_p3 }
  0x3a   : > { %692 = shalt.err (!%p689_p13)
}
  0x3b   : > { %s820_s7 = smov 128   ;;  %s821_s29 = smov 8  }
  0x3c   : > { %585 = dma.hbm_to_vmem [thread:$0]  (!%p954_p4), %s946_s23, 256, %s950_s27, %s192_s30, %s820_s7, %s820_s7, %s821_s29  }
  0x3d   : > { %p259_p0 = scmp.lt.s32.totalorder %s817_s21, 3  ;;  %s1137_s13 = sshll.u32 %s895_s26, 8 }
  0x3e   : > { %s996_s18 = scalar_lea.hbm %s1119_s1, %s1137_s13  ;;  %p1138_p1 = scmp.ge.s32.totalorder %s817_s21, 1 }
  0x3f   : > { %s1140_s0 = sshll.u32 %s937_s11, 4  ;;  %s215_s26 = scalar_lea.sflag [#allocation6], %s937_s11 }
  0x40   : > { %p1000_p3 = pnand %p1138_p1, %p259_p0  ;;  %s218_s5 = scalar_lea.vmem [#allocation5], %s1140_s0 }
  0x41   : > { %s227_s20 = sshll.u32 %s218_s5, 4  ;;  %s693_s23 = scalar_lea.hbm %s996_s18, 256  ;;  %s1006_s20 = int_to_ptr.vmem [resolvable:$true] %s227_s20 }
  0x42   : > { %p694_p5 = scmp.ne.s32.totalorder %s996_s18, %s693_s23  ;;  %s698_s13 = scalar_lea.hbm %s1119_s1, 256 }
  0x43   : > { %p699_p7 = scmp.lt.u32.totalorder %s996_s18, %s1119_s1  ;;  %p700_p10 = scmp.lt.u32.totalorder %s698_s13, %s693_s23 }
  0x44   : > { %p696_p11 = pnand %p694_p5, %p665_p9  ;;  %p702_p12 = scmp.lt.u32.totalorder %s693_s23, %s996_s18 }
  0x45   : > { %p701_p6 = por %p700_p10, %p699_p7 }
  0x46   : > { %p697_p2 = pneg %p696_p11 }
  0x47   : > { %p703_p13 = por %p702_p12, %p701_p6 }
  0x49   : > { %p704_p0 = pnand %p703_p13, %p697_p2 }
  0x4b   : > { %707 = shalt.err (!%p704_p0)
}
  0x4c   : > { %s708_s0 = scalar_lea.vmem %s1006_s20, 256  ;;  %s822_s5 = smov [#allocation5]  }
  0x4d   : > { %p709_p1 = scmp.ne.s32.totalorder %s1006_s20, %s708_s0  ;;  %s713_s27 = sshll.u32 %s822_s5, 4  ;;  %s714_s27 = int_to_ptr.vmem [resolvable:$false] %s713_s27 }
  0x4e   : > { %s715_s30 = scalar_lea.vmem %s714_s27, 512  ;;  %p716_p8 = scmp.lt.s32.totalorder %s1006_s20, %s714_s27 }
  0x4f   : > { %p711_p5 = pnand %p709_p1, %p665_p9  ;;  %p717_p7 = scmp.lt.s32.totalorder %s715_s30, %s708_s0 }
  0x51   : > { %p712_p11 = pneg %p711_p5  ;;  %p718_p10 = por %p717_p7, %p716_p8 }
  0x53   : > { %p719_p6 = pnand %p718_p10, %p712_p11 }
  0x55   : > { %722 = shalt.err (!%p719_p6)
}
  0x56   : > { %588 = dma.hbm_to_vmem [thread:$0]  (!%p954_p4), %s996_s18, 256, %s1006_s20, %s215_s26, %s820_s7, %s820_s7, %s821_s29  }
  0x57   : > { %263 = sbr.rel (%p1000_p3) target bundleno = 187 (0xbb), region = 36  ;;  %s265_s23 = sand.u32 (!%p1000_p3), 1, %s809_s19  }
  0x58   : > { %s553_s13 = sshll.u32 (!%p1000_p3), %s265_s23, 4  ;;  %s266_s25 = scalar_lea.sflag (!%p1000_p3), [#allocation3], %s265_s23 }
  0x59   : > { %s269_s14 = scalar_lea.vmem (!%p1000_p3), [#allocation2], %s553_s13  ;;  %p1141_p8 = scmp.ne.s32.totalorder (!%p1000_p3), %s1132_s6, 0 }
  0x5e   : > { %780 = dma.done.wait (%p1141_p8), %s266_s25, 256  }
  0x5f   : > { %782 = vsyncadd (%p1141_p8), %s266_s25, 4294967040  ;;  %s275_s28 = scalar_lea.sflag [#allocation6], %s265_s23  ;;  %s278_s11 = scalar_lea.vmem [#allocation5], %s553_s13 }
  0x60   : > { %784 = dma.done.wait (%p1141_p8), %s275_s28, 256  }
  0x61   : > { %786 = vsyncadd (%p1141_p8), %s275_s28, 4294967040  ;;  %s317_s20 = sand.u32 1, %s797_s16   ;;  %p568_p4 = scmp.ge.s32.totalorder %s885_s22, 1 }
  0x62   : > { %s555_s7 = sshll.u32 %s317_s20, 1  ;;  %v348_v0 = vld [vmem:[%s269_s14] sm:$0xff] (!%p568_p4)  ;;  %v349_v1 = vld [vmem:[%s269_s14 + $0x8] sm:$0xff] (!%p568_p4)  ;;  %v823_v3 = vmov (!%p568_p4), 0.0  }
  0x63   : > { %s1051_s29 = scalar_lea.vmem [#allocation7], %s555_s7  ;;  %347 = sbr.rel (%p568_p4) target bundleno = 150 (0x96), region = 48  ;;  %v358_v2 = vand.u32 (!%p568_p4), 2147483647, %v348_v0  ;;  %v359_v4 = vand.u32 (!%p568_p4), 2147483647, %v349_v1 }
  0x64   : > { %394 = vst [vmem:[%s1051_s29 + $0x1] sm:$0x1] (!%p568_p4), %v823_v3  ;;  %v350_v15 = vld [vmem:[%s278_s11] sm:$0xff] (!%p568_p4)  ;;  %v351_v16 = vld [vmem:[%s278_s11 + $0x8] sm:$0xff] (!%p568_p4)  ;;  %v352_v18 = vmax.f32 (!%p568_p4), %v348_v0, 0.0  ;;  %v353_v22 = vmax.f32 (!%p568_p4), %v349_v1, 0.0 }
  0x65   : > { %v360_v5 = vsub.f32 (!%p568_p4), 0.0, %v358_v2  ;;  %v361_v6 = vsub.f32 (!%p568_p4), 0.0, %v359_v4  ;;  %v354_v19 = vmul.f32 (!%p568_p4), %v350_v15, %v348_v0  ;;  %v355_v23 = vmul.f32 (!%p568_p4), %v351_v16, %v349_v1 }
  0x67   : > { %v362_v7 = vmul.f32 (!%p568_p4), 1.442695, %v360_v5  ;;  %v364_v8 = vmul.f32 (!%p568_p4), 1.442695, %v361_v6  ;;  %v356_v27 = vsub.f32 (!%p568_p4), %v352_v18, %v354_v19  ;;  %v357_v30 = vsub.f32 (!%p568_p4), %v353_v22, %v355_v23 }
  0x69   : > { %655 = vpow2.f32 (!%p568_p4), %v362_v7 }
  0x6a   : > { %657 = vpow2.f32 %v364_v8 }
  0x73   : > { %v656_v9 = vpop.eup %655 }
  0x74   : > { %v658_v10 = vpop.eup %657  ;;  %v366_v11 = vadd.f32 1.0, %v656_v9  ;;  %v369_v13 = vmul.f32 -0.5, %v656_v9  ;;  %v372_v20 = vand.u32 2147483647, %v656_v9 }
  0x75   : > { %v375_v12 = vadd.f32 1.0, %v658_v10  ;;  %v378_v14 = vmul.f32 -0.5, %v658_v10  ;;  %v381_v24 = vand.u32 2147483647, %v658_v10 }
  0x76   : > { %659 = vlog2.f32 %v366_v11  ;;  %v370_v17 = vadd.f32 1.0, %v369_v13  ;;  %vm373_vm0 = vcmp.lt.f32.partialorder %v372_v20, 0.0004427343 }
  0x77   : > { %661 = vlog2.f32 %v375_v12  ;;  %v379_v21 = vadd.f32 1.0, %v378_v14  ;;  %vm382_vm1 = vcmp.lt.f32.partialorder %v381_v24, 0.0004427343 }
  0x78   : > { %v371_v25 = vmul.f32 %v656_v9, %v370_v17 }
  0x79   : > { %v380_v28 = vmul.f32 %v658_v10, %v379_v21 }
  0x80   : > { %v660_v26 = vpop.eup %659 }
  0x81   : > { %v662_v29 = vpop.eup %661  ;;  %v368_v31 = vmul.f32 0.6931472, %v660_v26 }
  0x82   : > { %v377_v32 = vmul.f32 0.6931472, %v662_v29 }
  0x83   : > { %v374_v33 = vsel %vm373_vm0, %v371_v25, %v368_v31 }
  0x84   : > { %v383_v34 = vsel %vm382_vm1, %v380_v28, %v377_v32  ;;  %v384_v35 = vadd.f32 %v374_v33, %v356_v27 }
  0x85   : > { %v385_v36 = vadd.f32 %v383_v34, %v357_v30 }
  0x87   : > { %v386_v37 = vadd.f32 %v385_v36, %v384_v35 }
  0x89   : > { %v387_v38 = vrot.slane %v386_v37, 4 }
  0x8b   : > { %v388_v39 = vadd.f32 %v387_v38, %v386_v37 }
  0x8d   : > { %v389_v40 = vrot.slane %v388_v39, 2 }
  0x8f   : > { %v390_v41 = vadd.f32 %v389_v40, %v388_v39 }
  0x91   : > { %v391_v42 = vrot.slane %v390_v41, 1 }
  0x93   : > { %v392_v43 = vadd.f32 %v391_v42, %v390_v41 }
  0x95   : > { %393 = vst [vmem:[%s1051_s29] sm:$0x1] %v392_v43 }
  0x96 PF: > { %p569_p9 = scmp.lt.s32.totalorder %s885_s22, 1 }
  0x97   : > { %v399_v44 = vld [vmem:[%s1120_s2] sm:$0x1] (!%p569_p9)  ;;  %v403_v46 = vlaneseq (!%p569_p9)  ;;  %v824_v48 = vmov (!%p569_p9), 0.0  }
  0x98   : > { %398 = sbr.rel (%p569_p9) target bundleno = 162 (0xa2), region = 52  ;;  %v400_v45 = vld [vmem:[%s1121_s3] sm:$0x1] (!%p569_p9)  ;;  %413 = vst [vmem:[%s1051_s29] sm:$0x1] (!%p569_p9), %v824_v48 }
  0x99   : > { %v401_v47 = vsub.f32 (!%p569_p9), %v399_v44, %v400_v45  ;;  %v404_v49 = vshrl.u32 (!%p569_p9), %v403_v46, 7  ;;  %v406_v50 = vand.u32 (!%p569_p9), 127, %v403_v46 }
  0x9b   : > { %v407_v51 = vmul.u32 (!%p569_p9), 128, %v404_v49  ;;  %v402_v52 = vmul.f32 (!%p569_p9), %v401_v47, %v401_v47 }
  0x9d   : > { %v408_v53 = vadd.s32 (!%p569_p9), %v407_v51, %v406_v50 }
  0x9f   : > { %vm409_vm2 = vcmp.lt.s32.totalorder %v408_v53, 64 }
  0xa0   : > { %v410_v54 = vsel %vm409_vm2, %v402_v52, 0.0 }
  0xa1   : > { %412 = vst [vmem:[%s1051_s29 + $0x1] sm:$0x1] %v410_v54 }
  0xa2 PF: > { %s571_s0 = sshll.u32 %s885_s22, 5  ;;  %s428_s23 = sshll.u32 %s1051_s29, 4  ;;  %s429_s23 = int_to_ptr.vmem [resolvable:$true] %s428_s23 }
  0xa3   : > { %s1069_s30 = scalar_lea.hbm %s1122_s4, %s571_s0  ;;  %s415_s13 = scalar_lea.sflag [#allocation4], %s317_s20 }
  0xa4   : > { %s723_s25 = scalar_lea.vmem %s429_s23, 32  ;;  %p1142_p2 = scmp.ne.s32.totalorder %s1133_s9, 0 }
  0xa5   : > { %p724_p3 = scmp.ne.s32.totalorder %s429_s23, %s723_s25  ;;  %s825_s14 = smov [#allocation7]  }
  0xa6   : > { %s727_s28 = sshll.u32 %s825_s14, 4  ;;  %s728_s28 = int_to_ptr.vmem [resolvable:$false] %s727_s28 }
  0xa7   : > { %p725_p12 = pnand %p724_p3, %p1142_p2  ;;  %s729_s11 = scalar_lea.vmem %s728_s28, 64 }
  0xa8   : > { %p730_p0 = scmp.lt.s32.totalorder %s429_s23, %s728_s28  ;;  %p731_p1 = scmp.lt.s32.totalorder %s729_s11, %s723_s25 }
  0xa9   : > { %p726_p13 = pneg %p725_p12 }
  0xaa   : > { %p732_p5 = por %p731_p1, %p730_p0 }
  0xac   : > { %p733_p11 = pnand %p732_p5, %p726_p13 }
  0xae   : > { %736 = shalt.err (!%p733_p11)
}
  0xaf   : > { %s737_s22 = scalar_lea.hbm %s1069_s30, 32  ;;  %s741_s29 = scalar_lea.hbm %s1122_s4, 64 }
  0xb0   : > { %p738_p7 = scmp.ne.s32.totalorder %s1069_s30, %s737_s22  ;;  %p742_p8 = scmp.lt.u32.totalorder %s1069_s30, %s1122_s4 }
  0xb1   : > { %p743_p4 = scmp.lt.u32.totalorder %s741_s29, %s737_s22  ;;  %p745_p3 = scmp.lt.u32.totalorder %s737_s22, %s1069_s30 }
  0xb2   : > { %p739_p10 = pnand %p738_p7, %p1142_p2 }
  0xb3   : > { %p744_p9 = por %p743_p4, %p742_p8 }
  0xb4   : > { %p740_p6 = pneg %p739_p10 }
  0xb5   : > { %p746_p12 = por %p745_p3, %p744_p9 }
  0xb7   : > { %p747_p13 = pnand %p746_p12, %p740_p6 }
  0xb9   : > { %750 = shalt.err (!%p747_p13)
}
  0xba   : > { %580 = dma.vmem_to_hbm [thread:$0]  (%p1142_p2), %s429_s23, 32, %s1069_s30, %s415_s13  }
  0xbb PF: > { %s440_s12 = sand.u32 1, %s793_s15   ;;  %p1143_p0 = scmp.ne.s32.totalorder %s1134_s10, 0 }
  0xbc   : > { %p1144_p1 = scmp.ge.s32.totalorder %s817_s21, 2  ;;  %s441_s26 = scalar_lea.sflag [#allocation4], %s440_s12 }
  0xbe   : > { %p590_p5 = pnand %p1144_p1, %p1143_p0 }
  0xc0   : > { %788 = dma.done.wait (!%p590_p5), %s441_s26, 32  }
  0xc1   : > { %790 = vsyncadd (!%p590_p5), %s441_s26, 4294967264  ;;  %s1145_s0 = sld [smem:[#allocation11_spill]]  ;;  %s1146_s20 = sld [smem:[#allocation12_spill]] }
  0xc2   : > { %p20_p2 = scmp.ge.s32.totalorder %s889_s24, 4   ;;  %s1147_s15 = smov %s797_s16 }
  0xc3   : > { %s1148_s16 = smov %s801_s17  ;;  %s1149_s17 = smov %s921_s8 }
  0xc4   : > { %s1150_s18 = smov %s809_s19  ;;  %s1152_s21 = smov %s889_s24 }
  0xc5   :  { %22 = sbr.rel (!%p20_p2) target bundleno = 11 (0xb), region = 108 }
  0xc7   : > { %s1151_s19 = smov %s1145_s0 }
  0xcc   :  { %446 = vsyncpa [#allocation3], 1 }
  0xcd   :  { %448 = vsyncpa [#allocation3 + $0x1], 1 }
  0xce   :  { %449 = vsyncpa [#allocation6], 1 }
  0xcf   :  { %451 = vsyncpa [#allocation6 + $0x1], 1 }
  0xd0   :  { %452 = vsyncpa [#allocation4], 1 }
  0xd1   :  { %454 = vsyncpa [#allocation4 + $0x1], 1 }

</bundles_post_ra>
